<compile_context>
chip_gen: v7x
topology: tpu7x:2x2x1
jax: 0.10.0
libtpu: 0.0.40
codegen_flags: <defaults>
</compile_context>

<pallas_src>
import functools

import jax
import jax.numpy as jnp
from jax.experimental import pallas as pl
from jax.experimental.pallas import tpu as pltpu


# ----------------------------------------------------------------------------
# Kernels
# ----------------------------------------------------------------------------
def _fold_lane_chunks(x_ref, init):
    """Sum the (C, TS) tile of x_ref[0] into a (C, 128) f32 accumulator.

    Only aligned 128-lane vreg selections + VPU adds; the expensive cross-lane
    (XLU) 128->1 reduce is deferred to the per-batch finalization.
    """
    ts = x_ref.shape[2]
    acc = init
    for k in range(ts // 128):
        acc = acc + x_ref[0, :, k * 128:(k + 1) * 128].astype(jnp.float32)
    return acc


def _excite(y_col, w1_ref, b1_ref, w2t_ref, b2_ref):
    """fc1 -> ReLU -> fc2 -> sigmoid on the VPU (tiny matrices, no MXU).

    y_col: (C, 1) f32 channel means.  Returns the (C, 1) f32 gate.
    """
    # (C,1)*(C,hid) -> (C,hid); sublane reduce -> (1,hid)
    h = jnp.sum(w1_ref[...] * y_col, axis=0, keepdims=True) + b1_ref[...]
    h = jnp.maximum(h, 0.0)
    # (C,hid)*(1,hid) -> (C,hid); lane reduce -> (C,1)
    g = jnp.sum(w2t_ref[...] * h, axis=1, keepdims=True) + b2_ref[...]
    return jax.nn.sigmoid(g)


def _fused_kernel(x_ref, w1_ref, b1_ref, w2t_ref, b2_ref, o_ref, *, s_true):
    # x_ref/o_ref: (1, C, S_pad); weights resident across the grid.
    acc = _fold_lane_chunks(x_ref, jnp.zeros((x_ref.shape[1], 128), jnp.float32))
    y = jnp.sum(acc, axis=-1, keepdims=True) * (1.0 / s_true)        # (C, 1)
    gate = _excite(y, w1_ref, b1_ref, w2t_ref, b2_ref)               # (C, 1)
    # Scale in the input dtype (single gate cast; no f32 copy of the slab).
    # NOTE: on v5e (no bf16 VALU) the compiler inserts casts for bf16 inputs.
    o_ref[...] = x_ref[...] * gate.astype(o_ref.dtype)[None, :, :]


def _gate_kernel(x_ref, w1_ref, b1_ref, w2t_ref, b2_ref, gate_ref, acc_ref,
                 *, s_true):
    # x_ref: (1, C, TS); gate_ref: (1, C, 1); acc_ref: (C, 128) f32 scratch.
    s_idx = pl.program_id(1)

    @pl.when(s_idx == 0)
    def _init():
        acc_ref[...] = jnp.zeros_like(acc_ref)

    acc_ref[...] = _fold_lane_chunks(x_ref, acc_ref[...])

    @pl.when(s_idx == pl.num_programs(1) - 1)
    def _finalize():
        y = jnp.sum(acc_ref[...], axis=-1, keepdims=True) * (1.0 / s_true)
        gate = _excite(y, w1_ref, b1_ref, w2t_ref, b2_ref)           # (C, 1)
        gate_ref[...] = gate[None, :, :]


def _scale_kernel(gate_ref, x_ref, o_ref):
    # gate_ref: (1, C, 1) f32; x_ref/o_ref: (1, C, TS).
    g = gate_ref[...].astype(o_ref.dtype)
    o_ref[...] = x_ref[...] * g


# ----------------------------------------------------------------------------
# Wrappers
# ----------------------------------------------------------------------------
def _se_fused(x_flat, w1, b1_r, w2t, b2_c, s_true):
    B, C, S = x_flat.shape
    hid = w1.shape[1]
    itemsize = x_flat.dtype.itemsize
    slab = C * S * itemsize
    vmem_limit = int(min(max(4 * slab + (4 << 20), 16 << 20), 48 << 20))

    return pl.pallas_call(
        functools.partial(_fused_kernel, s_true=s_true),
        out_shape=jax.ShapeDtypeStruct((B, C, S), x_flat.dtype),
        grid_spec=pltpu.PrefetchScalarGridSpec(
            num_scalar_prefetch=0,
            grid=(B,),
            in_specs=[
                pl.BlockSpec((1, C, S), lambda b: (b, 0, 0)),     # x slab
                pl.BlockSpec((C, hid), lambda b: (0, 0)),          # w1
                pl.BlockSpec((1, hid), lambda b: (0, 0)),          # b1
                pl.BlockSpec((C, hid), lambda b: (0, 0)),          # w2^T
                pl.BlockSpec((C, 1), lambda b: (0, 0)),            # b2
            ],
            out_specs=pl.BlockSpec((1, C, S), lambda b: (b, 0, 0)),
        ),
        compiler_params=pltpu.CompilerParams(
            dimension_semantics=("parallel",),
            vmem_limit_bytes=vmem_limit,
        ),
        cost_estimate=pl.CostEstimate(
            flops=2 * B * C * S,
            transcendentals=B * (C + hid),
            bytes_accessed=2 * B * C * S * itemsize,
        ),
    )(x_flat, w1, b1_r, w2t, b2_c)


def _se_two_pass(x_flat, w1, b1_r, w2t, b2_c, s_true,
                 tile_budget_bytes=16 << 20, max_lanes=1024):
    B, C, S = x_flat.shape
    hid = w1.shape[1]
    itemsize = x_flat.dtype.itemsize

    # Largest 128-multiple divisor of S under a VMEM budget of ~4
    # double-buffered (C, TS) slabs (pass-2 in + out) and a 1024-lane target.
    cap = max(128, min(S, max_lanes,
                       (tile_budget_bytes // (4 * C * itemsize)) // 128 * 128))
    ts = 128
    for cand in range(cap, 127, -128):
        if S % cand == 0:
            ts = cand
            break
    n_s = S // ts
    vmem_limit = int(min(max(4 * C * ts * itemsize + (4 << 20), 16 << 20), 48 << 20))

    # Pass 1: per-batch channel gates (B, C, 1).
    gates = pl.pallas_call(
        functools.partial(_gate_kernel, s_true=s_true),
        out_shape=jax.ShapeDtypeStruct((B, C, 1), jnp.float32),
        grid_spec=pltpu.PrefetchScalarGridSpec(
            num_scalar_prefetch=0,
            grid=(B, n_s),
            in_specs=[
                pl.BlockSpec((1, C, ts), lambda b, s: (b, 0, s)),  # x tile
                pl.BlockSpec((C, hid), lambda b, s: (0, 0)),        # w1
                pl.BlockSpec((1, hid), lambda b, s: (0, 0)),        # b1
                pl.BlockSpec((C, hid), lambda b, s: (0, 0)),        # w2^T
                pl.BlockSpec((C, 1), lambda b, s: (0, 0)),          # b2
            ],
            out_specs=pl.BlockSpec((1, C, 1), lambda b, s: (b, 0, 0)),
            scratch_shapes=[pltpu.VMEM((C, 128), jnp.float32)],
        ),
        compiler_params=pltpu.CompilerParams(
            dimension_semantics=("parallel", "arbitrary"),
            vmem_limit_bytes=vmem_limit,
        ),
        cost_estimate=pl.CostEstimate(
            flops=B * C * S,
            transcendentals=B * (C + hid),
            bytes_accessed=B * C * S * itemsize,
        ),
    )(x_flat, w1, b1_r, w2t, b2_c)

    # Pass 2: channel-wise rescale, fully parallel grid.
    out = pl.pallas_call(
        _scale_kernel,
        out_shape=jax.ShapeDtypeStruct((B, C, S), x_flat.dtype),
        grid_spec=pltpu.PrefetchScalarGridSpec(
            num_scalar_prefetch=0,
            grid=(B, n_s),
            in_specs=[
                pl.BlockSpec((1, C, 1), lambda b, s: (b, 0, 0)),    # gates
                pl.BlockSpec((1, C, ts), lambda b, s: (b, 0, s)),   # x tile
            ],
            out_specs=pl.BlockSpec((1, C, ts), lambda b, s: (b, 0, s)),
        ),
        compiler_params=pltpu.CompilerParams(
            dimension_semantics=("parallel", "parallel"),
            vmem_limit_bytes=vmem_limit,
        ),
        cost_estimate=pl.CostEstimate(
            flops=B * C * S,
            transcendentals=0,
            bytes_accessed=2 * B * C * S * itemsize,
        ),
    )(gates, x_flat)
    return out


def se_block(x, w1, b1, w2, b2, *, max_fused_bytes=16 * 1024 * 1024):
    """x: (B, C, T, H, W); weights follow the y @ w + b convention.

    w1: (C, C//r)  b1: (C//r,)   w2: (C//r, C)  b2: (C,)
    Returns x * sigmoid(fc2(relu(fc1(avgpool(x))))) with shape (B, C, T, H, W).
    """
    B, C, T, H, W = x.shape
    S = T * H * W
    hid = w1.shape[1]
    itemsize = x.dtype.itemsize

    # Lane-pad S so every tile is a full multiple of 128 lanes (unmasked stores).
    S_pad = ((S + 127) // 128) * 128
    x_flat = x.reshape(B, C, S)
    if S_pad != S:
        x_flat = jnp.pad(x_flat, ((0, 0), (0, 0), (0, S_pad - S)))

    # Parameter layouts chosen so the in-kernel excitation is pure VPU work.
    b1_r = b1.reshape(1, hid)
    w2t = w2.T                      # (C, hid)
    b2_c = b2.reshape(C, 1)

    fused_live = 4 * C * S_pad * itemsize   # in + out, both double-buffered
    if fused_live + (2 << 20) <= max_fused_bytes:
        out_flat = _se_fused(x_flat, w1, b1_r, w2t, b2_c, S)
    else:
        out_flat = _se_two_pass(x_flat, w1, b1_r, w2t, b2_c, S)

    if S_pad != S:
        out_flat = out_flat[:, :, :S]
    return out_flat.reshape(B, C, T, H, W)


def _reference(x, w1, b1, w2, b2):
    # Pure-JAX reference matching the PyTorch forward.
    y = jnp.mean(x, axis=(2, 3, 4))                              # (B, C)
    h = jnp.maximum(y @ w1 + b1, 0.0)
    s = jax.nn.sigmoid(h @ w2 + b2)
    return x * s[:, :, None, None, None]


if __name__ == "__main__":
    # Shapes consistent with SEBlock(channels=32, reduction_ratio=16)
    B, C, T, H, W = 2, 32, 4, 8, 8
    reduction_ratio = 16
    hid = C // reduction_ratio  # = 2

    key = jax.random.PRNGKey(0)
    kx, k1, k2, k3, k4, kx2 = jax.random.split(key, 6)

    x = jax.random.normal(kx, (B, C, T, H, W), dtype=jnp.float32)
    w1 = jax.random.normal(k1, (C, hid), dtype=jnp.float32) * 0.1
    b1 = jax.random.normal(k2, (hid,), dtype=jnp.float32) * 0.1
    w2 = jax.random.normal(k3, (hid, C), dtype=jnp.float32) * 0.1
    b2 = jax.random.normal(k4, (C,), dtype=jnp.float32) * 0.1

    ref = _reference(x, w1, b1, w2, b2)

    # Fused single-pass path (small slab fits VMEM).
    out_fused = jax.block_until_ready(se_block(x, w1, b1, w2, b2))
    assert out_fused.shape == (B, C, T, H, W)
    assert jnp.allclose(out_fused, ref, atol=1e-5, rtol=1e-5), "fused mismatch"

    # Two-pass S-tiled path (forced), as used for large C*S or v7x VMEM limits.
    out_tiled = jax.block_until_ready(se_block(x, w1, b1, w2, b2,
                                               max_fused_bytes=0))
    assert jnp.allclose(out_tiled, ref, atol=1e-5, rtol=1e-5), "two-pass mismatch"

    # Non-128-multiple spatial size exercises the lane-padding path (S = 75).
    x2 = jax.random.normal(kx2, (B, C, 3, 5, 5), dtype=jnp.float32)
    ref2 = _reference(x2, w1, b1, w2, b2)
    out2a = jax.block_until_ready(se_block(x2, w1, b1, w2, b2))
    out2b = jax.block_until_ready(se_block(x2, w1, b1, w2, b2,
                                           max_fused_bytes=0))
    assert jnp.allclose(out2a, ref2, atol=1e-5, rtol=1e-5), "padded fused mismatch"
    assert jnp.allclose(out2b, ref2, atol=1e-5, rtol=1e-5), "padded two-pass mismatch"

    print("KERNEL_OK")
</pallas_src>

<mosaic_0001>
module attributes {stable_mosaic.version = 11 : i64} {
  func.func @_fused_kernel(%arg0: i32, %arg1: memref<1x32x256xf32, #tpu.memory_space<vmem>>, %arg2: memref<32x2xf32, #tpu.memory_space<vmem>>, %arg3: memref<1x2xf32, #tpu.memory_space<vmem>>, %arg4: memref<32x2xf32, #tpu.memory_space<vmem>>, %arg5: memref<32x1xf32, #tpu.memory_space<vmem>>, %arg6: memref<1x32x256xf32, #tpu.memory_space<vmem>>) attributes {dimension_semantics = [#tpu.dimension_semantics<parallel>], iteration_bounds = array<i64: 2>, scalar_prefetch = 0 : i64, scratch_operands = 0 : i64, tpu.core_type = #tpu.core_type<tc>, window_params = [{transform_indices = @transform_0, window_bounds = array<i64: 1, 32, 256>}, {pipeline_mode = #tpu.pipeline_mode<synchronous>, transform_indices = @transform_1, window_bounds = array<i64: 32, 2>}, {pipeline_mode = #tpu.pipeline_mode<synchronous>, transform_indices = @transform_2, window_bounds = array<i64: 1, 2>}, {pipeline_mode = #tpu.pipeline_mode<synchronous>, transform_indices = @transform_3, window_bounds = array<i64: 32, 2>}, {pipeline_mode = #tpu.pipeline_mode<synchronous>, transform_indices = @transform_4, window_bounds = array<i64: 32, 1>}, {transform_indices = @transform_5, window_bounds = array<i64: 1, 32, 256>}]} {
    %cst = arith.constant 0.000000e+00 : f32
    %0 = vector.broadcast %cst : f32 to vector<32x128xf32>
    %c0 = arith.constant 0 : index
    %c0_0 = arith.constant 0 : index
    %c0_1 = arith.constant 0 : index
    %1 = vector.load %arg1[%c0, %c0_0, %c0_1] : memref<1x32x256xf32, #tpu.memory_space<vmem>>, vector<1x32x128xf32>
    %2 = vector.shape_cast %1 : vector<1x32x128xf32> to vector<32x128xf32>
    %3 = arith.addf %0, %2 : vector<32x128xf32>
    %c0_2 = arith.constant 0 : index
    %c0_3 = arith.constant 0 : index
    %c128 = arith.constant 128 : index
    %4 = vector.load %arg1[%c0_2, %c0_3, %c128] : memref<1x32x256xf32, #tpu.memory_space<vmem>>, vector<1x32x128xf32>
    %5 = vector.shape_cast %4 : vector<1x32x128xf32> to vector<32x128xf32>
    %6 = arith.addf %3, %5 : vector<32x128xf32>
    %cst_4 = arith.constant dense<0.000000e+00> : vector<32xf32>
    %7 = vector.multi_reduction <add>, %6, %cst_4 [1] : vector<32x128xf32> to vector<32xf32>
    %8 = vector.shape_cast %7 : vector<32xf32> to vector<32x1xf32>
    %cst_5 = arith.constant 3.906250e-03 : f32
    %9 = vector.broadcast %cst_5 : f32 to vector<32x1xf32>
    %10 = arith.mulf %8, %9 : vector<32x1xf32>
    %c0_6 = arith.constant 0 : index
    %c0_7 = arith.constant 0 : index
    %11 = vector.load %arg2[%c0_6, %c0_7] : memref<32x2xf32, #tpu.memory_space<vmem>>, vector<32x2xf32>
    %12 = vector.broadcast %10 : vector<32x1xf32> to vector<32x2xf32>
    %13 = arith.mulf %11, %12 : vector<32x2xf32>
    %cst_8 = arith.constant dense<0.000000e+00> : vector<2xf32>
    %14 = vector.multi_reduction <add>, %13, %cst_8 [0] : vector<32x2xf32> to vector<2xf32>
    %15 = vector.shape_cast %14 : vector<2xf32> to vector<1x2xf32>
    %c0_9 = arith.constant 0 : index
    %c0_10 = arith.constant 0 : index
    %16 = vector.load %arg3[%c0_9, %c0_10] : memref<1x2xf32, #tpu.memory_space<vmem>>, vector<1x2xf32>
    %17 = arith.addf %15, %16 : vector<1x2xf32>
    %cst_11 = arith.constant 0.000000e+00 : f32
    %18 = vector.broadcast %cst_11 : f32 to vector<1x2xf32>
    %19 = arith.maximumf %17, %18 : vector<1x2xf32>
    %c0_12 = arith.constant 0 : index
    %c0_13 = arith.constant 0 : index
    %20 = vector.load %arg4[%c0_12, %c0_13] : memref<32x2xf32, #tpu.memory_space<vmem>>, vector<32x2xf32>
    %21 = vector.broadcast %19 : vector<1x2xf32> to vector<32x2xf32>
    %22 = arith.mulf %20, %21 : vector<32x2xf32>
    %cst_14 = arith.constant dense<0.000000e+00> : vector<32xf32>
    %23 = vector.multi_reduction <add>, %22, %cst_14 [1] : vector<32x2xf32> to vector<32xf32>
    %24 = vector.shape_cast %23 : vector<32xf32> to vector<32x1xf32>
    %c0_15 = arith.constant 0 : index
    %c0_16 = arith.constant 0 : index
    %25 = vector.load %arg5[%c0_15, %c0_16] : memref<32x1xf32, #tpu.memory_space<vmem>>, vector<32x1xf32>
    %26 = arith.addf %24, %25 : vector<32x1xf32>
    %27 = arith.negf %26 : vector<32x1xf32>
    %28 = math.exp %27 : vector<32x1xf32>
    %cst_17 = arith.constant 1.000000e+00 : f32
    %29 = vector.broadcast %cst_17 : f32 to vector<32x1xf32>
    %30 = arith.addf %29, %28 : vector<32x1xf32>
    %31 = arith.divf %29, %30 : vector<32x1xf32>
    %c0_18 = arith.constant 0 : index
    %c0_19 = arith.constant 0 : index
    %c0_20 = arith.constant 0 : index
    %32 = vector.load %arg1[%c0_18, %c0_19, %c0_20] : memref<1x32x256xf32, #tpu.memory_space<vmem>>, vector<1x32x256xf32>
    %33 = vector.shape_cast %31 : vector<32x1xf32> to vector<1x32x1xf32>
    %34 = vector.broadcast %33 : vector<1x32x1xf32> to vector<1x32x256xf32>
    %35 = arith.mulf %32, %34 : vector<1x32x256xf32>
    %c0_21 = arith.constant 0 : index
    %c0_22 = arith.constant 0 : index
    %c0_23 = arith.constant 0 : index
    %36 = vector.load %arg6[%c0_21, %c0_22, %c0_23] : memref<1x32x256xf32, #tpu.memory_space<vmem>>, vector<1x32x256xf32>
    tpu.vector_store %arg6[%c0_21, %c0_22, %c0_23], %35 {strides = array<i32>} : memref<1x32x256xf32, #tpu.memory_space<vmem>>, vector<1x32x256xf32>,
    return
  }
  func.func @transform_0(%arg0: i32) -> (i32, i32, i32) {
    %c0_i32 = arith.constant 0 : i32
    %c0_i32_0 = arith.constant 0 : i32
    %c0_i32_1 = arith.constant 0 : i32
    return %arg0, %c0_i32, %c0_i32_0 : i32, i32, i32
  }
  func.func @transform_1(%arg0: i32) -> (i32, i32) {
    %c0_i32 = arith.constant 0 : i32
    %c0_i32_0 = arith.constant 0 : i32
    %c0_i32_1 = arith.constant 0 : i32
    return %c0_i32, %c0_i32_0 : i32, i32
  }
  func.func @transform_2(%arg0: i32) -> (i32, i32) {
    %c0_i32 = arith.constant 0 : i32
    %c0_i32_0 = arith.constant 0 : i32
    %c0_i32_1 = arith.constant 0 : i32
    return %c0_i32, %c0_i32_0 : i32, i32
  }
  func.func @transform_3(%arg0: i32) -> (i32, i32) {
    %c0_i32 = arith.constant 0 : i32
    %c0_i32_0 = arith.constant 0 : i32
    %c0_i32_1 = arith.constant 0 : i32
    return %c0_i32, %c0_i32_0 : i32, i32
  }
  func.func @transform_4(%arg0: i32) -> (i32, i32) {
    %c0_i32 = arith.constant 0 : i32
    %c0_i32_0 = arith.constant 0 : i32
    %c0_i32_1 = arith.constant 0 : i32
    return %c0_i32, %c0_i32_0 : i32, i32
  }
  func.func @transform_5(%arg0: i32) -> (i32, i32, i32) {
    %c0_i32 = arith.constant 0 : i32
    %c0_i32_0 = arith.constant 0 : i32
    %c0_i32_1 = arith.constant 0 : i32
    return %arg0, %c0_i32, %c0_i32_0 : i32, i32, i32
  }
}

</mosaic_0001>

<bundles_post_ra>
// kernel: tpu_custom_call.1
= control target key start
LH: loop header
LB: loop body
LE: loop exit
PB: predicated region body
PF: predicated region fallthrough
CT: control target
= control target key end

     0   :  { %10 = vsyncpa [#allocation3], 0  ;;  %s948_s0 = inlined_call_operand.hbm [shape: f32[2,32,256], index: 0, kind: input, shape index: {}]   ;;  %s949_s1 = inlined_call_operand.vmem [shape: f32[32,2], index: 1, kind: input, shape index: {}]   ;;  %s950_s2 = inlined_call_operand.vmem [shape: f32[1,2], index: 2, kind: input, shape index: {}]   ;;  %s951_s3 = inlined_call_operand.vmem [shape: f32[32,2], index: 3, kind: input, shape index: {}]   ;;  %s952_s4 = inlined_call_operand.vmem [shape: f32[32,1], index: 4, kind: input, shape index: {}]   ;;  %s953_s5 = inlined_call_operand.hbm [shape: f32[2,32,256], index: 5, kind: output, shape index: {}]  }
   0x1   :  { %12 = vsyncpa [#allocation3 + $0x1], 0 }
   0x2   :  { %13 = vsyncpa [#allocation4], 0 }
   0x3   :  { %15 = vsyncpa [#allocation4 + $0x1], 0  ;;  %s703_s18 = smov 0   ;;  %s705_s19 = smov 0  }
   0x4   :  { %s707_s20 = smov 0   ;;  %s709_s21 = smov 0  }
   0x5 LB: > { %s724_s22 = sadd.s32 4294967295, %s664_s21   ;;  %s479_s23 = sadd.s32 4294967294, %s664_s21   ;;  %s664_s21 = sphi %s709_s21, %s966_s21   ;;  %s660_s20 = sphi %s707_s20, %s965_s20   ;;  %s656_s19 = sphi %s705_s19, %s964_s19   ;;  %s652_s18 = sphi %s703_s18, %s963_s18  }
   0x6   : > { %s728_s24 = sadd.s32 1, %s664_s21   ;;  %s28_s25 = sadd.s32 1, %s660_s20 }
   0x7   : > { %s25_s26 = ssub.s32 %s664_s21, %s728_s24  ;;  %p35_p0 = scmp.ne.s32.totalorder %s660_s20, %s656_s19 }
   0x8   : > { %p26_p1 = scmp.eq.s32.totalorder %s25_s26, 0  ;;  %p36_p2 = scmp.eq.s32.totalorder %s664_s21, 0 }
   0x9   : > { %p41_p3 = scmp.ne.s32.totalorder %s656_s19, %s652_s18  ;;  %p42_p4 = scmp.eq.s32.totalorder %s724_s22, 0 }
   0xa   : > { %s740_s27 = scalar_select %p26_p1, %s660_s20, %s28_s25  }
   0xb   : > { %p742_p5 = por %p36_p2, %p35_p0  ;;  %p746_p6 = por %p42_p4, %p41_p3 }
   0xc   : > { %p149_p7 = scmp.eq.s32.totalorder %s724_s22, 1  ;;  %p155_p8 = scmp.eq.s32.totalorder %s479_s23, 1 }
   0xd   : > { %p511_p10 = scmp.lt.s32.totalorder %s664_s21, 2  ;;  %s187_s7 = sand.u32 1, %s660_s20  }
   0xe   : > { %p753_p11 = por %p149_p7, %p35_p0  ;;  %p757_p12 = por %p155_p8, %p41_p3 }
   0xf   : > { %s497_s8 = sshll.u32 %s664_s21, 10  ;;  %s482_s9 = sshll.u32 %s187_s7, 6 }
  0x10   : > { %s957_s30 = scalar_select %p753_p11, 1, 0 }
  0x11   : > { %s958_s6 = scalar_select %p757_p12, 1, 0 }
  0x12   : > { %s766_s12 = scalar_lea.hbm %s948_s0, %s497_s8  ;;  %s191_s13 = scalar_lea.vmem [#allocation2], %s482_s9 }
  0x13   : > { %s198_s14 = sshll.u32 %s191_s13, 4  ;;  %p770_p13 = pnand %p511_p10, %p742_p5  ;;  %s774_s14 = int_to_ptr.vmem [resolvable:$true] %s198_s14 }
  0x14   : > { %s776_s16 = scalar_lea.sflag [#allocation3], %s187_s7  ;;  %s568_s17 = scalar_lea.hbm %s766_s12, 1024 }
  0x15   : > { %p569_p0 = scmp.ne.s32.totalorder %s766_s12, %s568_s17  ;;  %p570_p1 = pneg %p770_p13 }
  0x16   : > { %s573_s26 = scalar_lea.hbm %s948_s0, 2048  ;;  %p574_p4 = scmp.lt.u32.totalorder %s766_s12, %s948_s0 }
  0x17   : > { %p571_p2 = pnand %p570_p1, %p569_p0  ;;  %p575_p5 = scmp.lt.u32.totalorder %s573_s26, %s568_s17 }
  0x18   : > { %p577_p8 = scmp.lt.u32.totalorder %s568_s17, %s766_s12 }
  0x19   : > { %p572_p3 = pneg %p571_p2  ;;  %p576_p7 = por %p575_p5, %p574_p4 }
  0x1b   : > { %p578_p10 = por %p577_p8, %p576_p7 }
  0x1d   : > { %p579_p9 = pnand %p578_p10, %p572_p3 }
  0x1f   : > { %582 = shalt.err (!%p579_p9)
}
  0x20   : > { %s583_s7 = scalar_lea.vmem %s774_s14, 1024  ;;  %s666_s9 = smov [#allocation2]  }
  0x21   : > { %p584_p0 = scmp.ne.s32.totalorder %s774_s14, %s583_s7  ;;  %s588_s10 = sshll.u32 %s666_s9, 4  ;;  %s589_s10 = int_to_ptr.vmem [resolvable:$false] %s588_s10 }
  0x22   : > { %s590_s11 = scalar_lea.vmem %s589_s10, 2048  ;;  %p591_p11 = scmp.lt.s32.totalorder %s774_s14, %s589_s10 }
  0x23   : > { %p586_p2 = pnand %p584_p0, %p570_p1  ;;  %p592_p4 = scmp.lt.s32.totalorder %s590_s11, %s583_s7 }
  0x25   : > { %p587_p12 = pneg %p586_p2  ;;  %p593_p5 = por %p592_p4, %p591_p11 }
  0x27   : > { %p594_p7 = pnand %p593_p5, %p587_p12 }
  0x29   : > { %597 = shalt.err (!%p594_p7)
}
  0x2a   : > { %s667_s13 = smov 256   ;;  %s668_s17 = smov 16  }
  0x2b   : > { %506 = dma.hbm_to_vmem [thread:$0]  (!%p770_p13), %s766_s12, 1024, %s774_s14, %s776_s16, %s667_s13, %s667_s13, %s668_s17  }
  0x2c   : > { %p485_p9 = scmp.ge.s32.totalorder %s664_s21, 1  ;;  %p206_p1 = scmp.lt.s32.totalorder %s664_s21, 3 }
  0x2e   : > { %p207_p3 = pnand %p485_p9, %p206_p1 }
  0x2f   : > { %s807_s23 = sand.u32 (!%p207_p3), 1, %s656_s19  }
  0x30   : > { %210 = sbr.rel (%p207_p3) target bundleno = 561 (0x231), region = 40  ;;  %s486_s25 = sshll.u32 (!%p207_p3), %s807_s23, 6 }
  0x31   : > { %s213_s26 = scalar_lea.sflag (!%p207_p3), [#allocation3], %s807_s23  ;;  %s216_s28 = scalar_lea.vmem (!%p207_p3), [#allocation2], %s486_s25 }
  0x37   : > { %643 = dma.done.wait (%p746_p6), %s213_s26, 1024  }
  0x38   : > { %645 = vsyncadd (%p746_p6), %s213_s26, 4294966272  ;;  %v817_v0 = vld [vmem:[%s216_s28] sm:$0xff]  ;;  %v819_v1 = vld [vmem:[%s216_s28 + $0x8] sm:$0xff]  ;;  %vm279_vm0 = vcmask 15360   ;;  %v300_v38 = vlaneseq  ;;  %v669_v60 = vmov 0   ;;  %s242_s26 = scalar_lea.vmem [#allocation5], %s486_s25 }
  0x39   : > { %v821_v2 = vld [vmem:[%s216_s28 + $0x20] sm:$0xff]  ;;  %v255_v3 = vadd.f32 %v819_v1, %v817_v0  ;;  %v825_v4 = vld [vmem:[%s216_s28 + $0x28] sm:$0xff]  ;;  %v827_v5 = vld [vmem:[%s216_s28 + $0x10] sm:$0xff]  ;;  %551 = vset.pattern.permute.xlu1 %v669_v60  ;;  %550 = vset.pattern.permute.xlu0 %v669_v60  ;;  %s498_s29 = sshll.u32 %s724_s22, 10  ;;  %s393_s22 = scalar_lea.sflag [#allocation4], %s807_s23 }
  0x3a   : > { %v829_v6 = vld [vmem:[%s216_s28 + $0x18] sm:$0xff]  ;;  %v257_v7 = vadd.f32 %v825_v4, %v821_v2  ;;  %v833_v8 = vld [vmem:[%s216_s28 + $0x30] sm:$0xff]  ;;  %v271_v15 = vld [vmem:[%s949_s1] sm:$0xff]  ;;  %v301_v41 = vshrl.u32 %v300_v38, 7  ;;  %s902_s14 = scalar_lea.hbm %s953_s5, %s498_s29  ;;  %p960_p11 = scmp.ne.s32.totalorder %s957_s30, 0 }
  0x3b   : > { %v835_v9 = vld [vmem:[%s216_s28 + $0x38] sm:$0xff]  ;;  %259 = vadd.xlane.f32.xlu0 %v255_v3  ;;  %v256_v10 = vadd.f32 %v829_v6, %v827_v5  ;;  %v273_v17 = vld [vmem:[%s949_s1 + $0x10] sm:$0xff]  ;;  %v272_v18 = vld [vmem:[%s949_s1 + $0x8] sm:$0xff]  ;;  %s406_s28 = sshll.u32 %s242_s26, 4  ;;  %s670_s16 = smov [#allocation5]   ;;  %s897_s28 = int_to_ptr.vmem [resolvable:$true] %s406_s28 }
  0x3c   : > { %263 = vadd.xlane.f32.xlu1 %v257_v7  ;;  %v258_v11 = vadd.f32 %v835_v9, %v833_v8  ;;  %v274_v22 = vld [vmem:[%s949_s1 + $0x18] sm:$0xff]  ;;  %v293_v42 = vld [vmem:[%s950_s2] sm:$0x1]  ;;  %v302_v45 = vsub.s32 0, %v301_v41  ;;  %v297_v47 = vld [vmem:[%s951_s3 + $0x8] sm:$0xff]  ;;  %s598_s15 = scalar_lea.vmem %s897_s28, 1024 }
  0x3d   : > { %v296_v48 = vld [vmem:[%s951_s3] sm:$0xff]  ;;  %v299_v50 = vld [vmem:[%s951_s3 + $0x18] sm:$0xff]  ;;  %v298_v51 = vld [vmem:[%s951_s3 + $0x10] sm:$0xff]  ;;  %p599_p6 = scmp.ne.s32.totalorder %s897_s28, %s598_s15  ;;  %s602_s8 = sshll.u32 %s670_s16, 4  ;;  %s603_s8 = int_to_ptr.vmem [resolvable:$false] %s602_s8 }
  0x3e   : > { %v321_v61 = vld [vmem:[%s952_s4 + $0x8] sm:$0xff]  ;;  %v320_v62 = vld [vmem:[%s952_s4] sm:$0xff]  ;;  %s604_s7 = scalar_lea.vmem %s603_s8, 2048  ;;  %p605_p8 = scmp.lt.s32.totalorder %s897_s28, %s603_s8 }
  0x3f   : > { %261 = vadd.xlane.f32.xlu0 %v256_v10  ;;  %p600_p12 = pnand %p599_p6, %p960_p11  ;;  %p606_p10 = scmp.lt.s32.totalorder %s604_s7, %s598_s15 }
  0x40   : > { %265 = vadd.xlane.f32.xlu1 %v258_v11  ;;  %v323_v11 = vld [vmem:[%s952_s4 + $0x18] sm:$0xff] }
  0x41   : > { %p601_p13 = pneg %p600_p12  ;;  %p607_p0 = por %p606_p10, %p605_p8 }
  0x43   : > { %p608_p2 = pnand %p607_p0, %p601_p13 }
  0xc8   : > { %v260_v12 = vpop.xlane.xlu0 %259 }
  0xc9   : > { %v267_v13 = vmul.f32 0.00390625, %v260_v12  ;;  %v264_v14 = vpop.xlane.xlu1 %263  ;;  %v322_v12 = vld [vmem:[%s952_s4 + $0x10] sm:$0xff] }
  0xca   : > { %v269_v16 = vmul.f32 0.00390625, %v264_v14 }
  0xcb   : > { %v275_v20 = vmul.f32 %v271_v15, %v267_v13 }
  0xcc   : > { %v262_v19 = vpop.xlane.xlu0 %261  ;;  %v277_v25 = vmul.f32 %v273_v17, %v269_v16 }
  0xcd   : > { %v268_v21 = vmul.f32 0.00390625, %v262_v19  ;;  %v266_v23 = vpop.xlane.xlu1 %265  ;;  %v280_v28 = vsel %vm279_vm0, %v275_v20, 0.0 }
  0xce   : > { %v270_v24 = vmul.f32 0.00390625, %v266_v23  ;;  %v283_v31 = vsel %vm279_vm0, %v277_v25, 0.0 }
  0xcf   : > { %v276_v26 = vmul.f32 %v272_v18, %v268_v21 }
  0xd0   : > { %v278_v27 = vmul.f32 %v274_v22, %v270_v24 }
  0xd1   : > { %v281_v29 = vsel %vm279_vm0, %v276_v26, 0.0 }
  0xd2   : > { %v282_v30 = vadd.f32 %v281_v29, %v280_v28  ;;  %v285_v32 = vsel %vm279_vm0, %v278_v27, 0.0 }
  0xd4   : > { %v284_v33 = vadd.f32 %v283_v31, %v282_v30 }
  0xd6   : > { %v286_v34 = vadd.f32 %v285_v32, %v284_v33 }
  0xd8   : > { %v287_v35 = vrot.slane %v286_v34, 4 }
  0xda   : > { %v288_v36 = vadd.f32 %v287_v35, %v286_v34 }
  0xdc   : > { %v289_v37 = vrot.slane %v288_v36, 2 }
  0xde   : > { %v290_v39 = vadd.f32 %v289_v37, %v288_v36 }
  0xe0   : > { %v291_v40 = vrot.slane %v290_v39, 1 }
  0xe2   : > { %v292_v43 = vadd.f32 %v291_v40, %v290_v39 }
  0xe4   : > { %v294_v44 = vadd.f32 %v293_v42, %v292_v43 }
  0xe6   : > { %v295_v46 = vmax.f32 %v294_v44, 0.0 }
  0xe8   : > { %v303_v49 = vrot.slane %v295_v46, %v302_v45 }
  0xea   : > { %v305_v52 = vmul.f32 %v303_v49, %v297_v47  ;;  %v304_v53 = vmul.f32 %v303_v49, %v296_v48  ;;  %v307_v56 = vmul.f32 %v303_v49, %v299_v50  ;;  %v306_v57 = vmul.f32 %v303_v49, %v298_v51 }
  0xec   : > { %v311_v54 = vsel %vm279_vm0, %v305_v52, 0.0  ;;  %v308_v55 = vsel %vm279_vm0, %v304_v53, 0.0  ;;  %v317_v58 = vsel %vm279_vm0, %v307_v56, 0.0  ;;  %v314_v59 = vsel %vm279_vm0, %v306_v57, 0.0 }
  0xed   : > { %312 = vadd.xlane.f32.xlu1 %v311_v54  ;;  %309 = vadd.xlane.f32.xlu0 %v308_v55 }
  0xf1   : > { %318 = vadd.xlane.f32.xlu1 %v317_v58  ;;  %315 = vadd.xlane.f32.xlu0 %v314_v59 }
 0x17a   : > { %v313_v63 = vpop.xlane.xlu1 %312  ;;  %v310_v3 = vpop.xlane.xlu0 %309 }
 0x17b   : > { %v325_v7 = vadd.f32 %v321_v61, %v313_v63  ;;  %v324_v10 = vadd.f32 %v320_v62, %v310_v3 }
 0x17d   : > { %v489_v13 = vmul.f32 -1.442695, %v325_v7  ;;  %v488_v14 = vmul.f32 -1.442695, %v324_v10 }
 0x17e   : > { %v319_v15 = vpop.xlane.xlu1 %318  ;;  %v316_v16 = vpop.xlane.xlu0 %315 }
 0x17f   : > { %552 = vpow2.f32 %v489_v13  ;;  %v327_v17 = vadd.f32 %v323_v11, %v319_v15  ;;  %v326_v18 = vadd.f32 %v322_v12, %v316_v16 }
 0x180   : > { %554 = vpow2.f32 %v488_v14 }
 0x181   : > { %v491_v19 = vmul.f32 -1.442695, %v327_v17  ;;  %v490_v20 = vmul.f32 -1.442695, %v326_v18 }
 0x183   : > { %556 = vpow2.f32 %v491_v19 }
 0x184   : > { %558 = vpow2.f32 %v490_v20 }
 0x189   : > { %v553_v21 = vpop.eup %552 }
 0x18a   : > { %v555_v22 = vpop.eup %554  ;;  %v341_v23 = vadd.f32 1.0, %v553_v21 }
 0x18b   : > { %v340_v24 = vadd.f32 1.0, %v555_v22 }
 0x18c   : > { %560 = vrcp.f32 %v341_v23 }
 0x18d   : > { %v557_v25 = vpop.eup %556  ;;  %562 = vrcp.f32 %v340_v24 }
 0x18e   : > { %v559_v26 = vpop.eup %558  ;;  %v343_v28 = vadd.f32 1.0, %v557_v25 }
 0x18f   : > { %v342_v27 = vadd.f32 1.0, %v559_v26 }
 0x191   : > { %564 = vrcp.f32 %v342_v27 }
 0x192   : > { %566 = vrcp.f32 %v343_v28 }
 0x196   : > { %v561_v29 = vpop.eup %560 }
 0x197   : > { %v563_v30 = vpop.eup %562  ;;  %363 = vperm.xlu1 %551, %v561_v29  }
 0x198   : > { %358 = vperm.xlu0 %550, %v563_v30  }
 0x19b   : > { %v565_v31 = vpop.eup %564 }
 0x19c   : > { %368 = vperm.xlu1 %551, %v565_v31   ;;  %v567_v32 = vpop.eup %566 }
 0x1a0   : > { %373 = vperm.xlu1 %551, %v567_v32  }
 0x216   : > { %v364_v33 = vpop.permute.xlu1 %363 }
 0x217   : > { %v378_v34 = vmul.f32 %v364_v33, %v827_v5  ;;  %v379_v35 = vmul.f32 %v364_v33, %v829_v6  ;;  %v359_v36 = vpop.permute.xlu0 %358 }
 0x218   : > { %v376_v37 = vmul.f32 %v359_v36, %v817_v0  ;;  %v377_v38 = vmul.f32 %v359_v36, %v819_v1 }
 0x219   : > { %386 = vst [vmem:[%s242_s26 + $0x10] sm:$0xff] %v378_v34  ;;  %387 = vst [vmem:[%s242_s26 + $0x18] sm:$0xff] %v379_v35 }
 0x21a   : > { %384 = vst [vmem:[%s242_s26] sm:$0xff] %v376_v37  ;;  %385 = vst [vmem:[%s242_s26 + $0x8] sm:$0xff] %v377_v38 }
 0x21b   : > { %v369_v39 = vpop.permute.xlu1 %368 }
 0x21c   : > { %v380_v40 = vmul.f32 %v369_v39, %v821_v2  ;;  %v381_v5 = vmul.f32 %v369_v39, %v825_v4 }
 0x21e   : > { %388 = vst [vmem:[%s242_s26 + $0x20] sm:$0xff] %v380_v40  ;;  %389 = vst [vmem:[%s242_s26 + $0x28] sm:$0xff] %v381_v5 }
 0x21f   : > { %v374_v0 = vpop.permute.xlu1 %373 }
 0x220   : > { %v382_v1 = vmul.f32 %v374_v0, %v833_v8  ;;  %v383_v2 = vmul.f32 %v374_v0, %v835_v9 }
 0x222   : > { %390 = vst [vmem:[%s242_s26 + $0x30] sm:$0xff] %v382_v1  ;;  %391 = vst [vmem:[%s242_s26 + $0x38] sm:$0xff] %v383_v2 }
 0x223   : > { %611 = shalt.err (!%p608_p2)
}
 0x224   : > { %s612_s9 = scalar_lea.hbm %s902_s14, 1024  ;;  %s616_s13 = scalar_lea.hbm %s953_s5, 2048 }
 0x225   : > { %p613_p4 = scmp.ne.s32.totalorder %s902_s14, %s612_s9  ;;  %p617_p9 = scmp.lt.u32.totalorder %s902_s14, %s953_s5 }
 0x226   : > { %p618_p1 = scmp.lt.u32.totalorder %s616_s13, %s612_s9  ;;  %p620_p6 = scmp.lt.u32.totalorder %s612_s9, %s902_s14 }
 0x227   : > { %p614_p5 = pnand %p613_p4, %p960_p11 }
 0x228   : > { %p619_p3 = por %p618_p1, %p617_p9 }
 0x229   : > { %p615_p7 = pneg %p614_p5 }
 0x22a   : > { %p621_p12 = por %p620_p6, %p619_p3 }
 0x22c   : > { %p622_p13 = pnand %p621_p12, %p615_p7 }
 0x22e   : > { %625 = shalt.err (!%p622_p13)
}
 0x22f   : > { %s671_s29 = smov 256   ;;  %s672_s25 = smov 16  }
 0x230   : > { %501 = dma.vmem_to_hbm [thread:$0]  (%p960_p11), %s897_s28, 1024, %s902_s14, %s393_s22, %s671_s29, %s671_s29, %s672_s25  }
 0x231 PF: > { %s421_s12 = sand.u32 1, %s652_s18   ;;  %p961_p8 = scmp.ne.s32.totalorder %s958_s6, 0 }
 0x232   : > { %p962_p10 = scmp.ge.s32.totalorder %s664_s21, 2  ;;  %s422_s15 = scalar_lea.sflag [#allocation4], %s421_s12 }
 0x234   : > { %p508_p0 = pnand %p962_p10, %p961_p8 }
 0x236   : > { %647 = dma.done.wait (!%p508_p0), %s422_s15, 1024  }
 0x237   : > { %649 = vsyncadd (!%p508_p0), %s422_s15, 4294966272  ;;  %p18_p2 = scmp.ge.s32.totalorder %s728_s24, 4   ;;  %s963_s18 = smov %s656_s19 }
 0x238   : > { %s964_s19 = smov %s660_s20  ;;  %s965_s20 = smov %s740_s27 }
 0x239   : > { %s966_s21 = smov %s728_s24  ;;  %20 = sbr.rel (!%p18_p2) target bundleno = 5 (0x5), region = 85 }
 0x240   :  { %427 = vsyncpa [#allocation3], 1 }
 0x241   :  { %429 = vsyncpa [#allocation3 + $0x1], 1 }
 0x242   :  { %430 = vsyncpa [#allocation4], 1 }
 0x243   :  { %432 = vsyncpa [#allocation4 + $0x1], 1 }

</bundles_post_ra>
